<compile_context>
chip_gen: v6e
topology: v6e:2x2x1
jax: 0.10.0
libtpu: 0.0.40
codegen_flags: <defaults>
</compile_context>

<pallas_src>
import jax
import jax.numpy as jnp
from jax.experimental import pallas as pl
from jax.experimental.pallas import tpu as pltpu

OUT_CLASSES = 2     # real number of classes
OUT_PAD = 128       # lane-dense padded output width


def output_kernel(x_ref, w1_ref, b1_ref, w23_ref, b23_ref, o_ref):
    # x_ref:   (TB, size)      bf16
    # w1_ref:  (size, h1)      bf16
    # b1_ref:  (1, h1)         f32
    # w23_ref: (h1, OUT_PAD)   bf16  (fc2 @ fc3 folded, zero-padded to 128 lanes)
    # b23_ref: (1, OUT_PAD)    f32
    # o_ref:   (TB, OUT_PAD)   f32
    x = x_ref[...]

    # fc1 (+ dropout == identity at inference) + ReLU6; f32 accumulation on MXU
    h1 = jnp.dot(x, w1_ref[...], preferred_element_type=jnp.float32) + b1_ref[...]
    h1 = jnp.minimum(jnp.maximum(h1, 0.0), 6.0)

    # fc2 and fc3 folded into a single matmul
    logits = (
        jnp.dot(h1.astype(jnp.bfloat16), w23_ref[...],
                preferred_element_type=jnp.float32)
        + b23_ref[...]
    )

    # softmax over the real classes only: mask padded lanes to -inf (exp -> 0)
    lane = jax.lax.broadcasted_iota(jnp.int32, logits.shape, 1)
    logits = jnp.where(lane < OUT_CLASSES, logits, -jnp.inf)
    m = jnp.max(logits, axis=-1, keepdims=True)
    e = jnp.exp(logits - m)
    o_ref[...] = e / jnp.sum(e, axis=-1, keepdims=True)


def _round_up(n, m):
    return ((n + m - 1) // m) * m


def output_forward(x_nchw, kernel_params, *, max_tb=128):
    """x_nchw: (B, C, H, W) float32. Returns (B, 2) softmax probabilities."""
    B = x_nchw.shape[0]
    # Same semantics as torch's x.reshape(x.shape[0], -1); cast to bf16 operands.
    x2d = x_nchw.reshape(B, -1).astype(jnp.bfloat16)
    size = x2d.shape[1]

    w1, b1, w23, b23 = kernel_params
    h1 = w1.shape[1]

    # Batch tile: multiple of 16 (bf16 sublane packing), up to max_tb.
    tb = min(max_tb, _round_up(B, 16))
    bp = _round_up(B, tb)
    if bp != B:
        # Zero-pad trailing rows; they produce valid (finite) softmax rows that
        # are sliced away below, so no masking is needed in the kernel.
        x2d = jnp.pad(x2d, ((0, bp - B), (0, 0)))

    # VMEM budget: resident weights + double-buffered x/out tiles + activations
    # + headroom; clamped below physical limits.
    vmem_bytes = (
        size * h1 * 2 + h1 * OUT_PAD * 2 + (h1 + OUT_PAD) * 4   # weights/biases
        + 2 * (tb * size * 2 + tb * OUT_PAD * 4)                # double-buffered tiles
        + tb * (h1 + OUT_PAD) * 4                               # intermediates
        + (4 << 20)                                             # headroom
    )
    vmem_bytes = int(min(vmem_bytes, 48 << 20))

    out_padded = pl.pallas_call(
        output_kernel,
        out_shape=jax.ShapeDtypeStruct((bp, OUT_PAD), jnp.float32),
        grid=(bp // tb,),
        in_specs=[
            pl.BlockSpec((tb, size), lambda i: (i, 0)),       # x tile (pipelined)
            pl.BlockSpec((size, h1), lambda i: (0, 0)),       # w1 (resident)
            pl.BlockSpec((1, h1), lambda i: (0, 0)),          # b1 (resident)
            pl.BlockSpec((h1, OUT_PAD), lambda i: (0, 0)),    # w23 (resident)
            pl.BlockSpec((1, OUT_PAD), lambda i: (0, 0)),     # b23 (resident)
        ],
        out_specs=pl.BlockSpec((tb, OUT_PAD), lambda i: (i, 0)),
        compiler_params=pltpu.CompilerParams(
            dimension_semantics=("parallel",),
            vmem_limit_bytes=vmem_bytes,
        ),
    )(x2d, w1, b1, w23, b23)

    return out_padded[:B, :OUT_CLASSES]


def init_params(key, size):
    """PyTorch-style init (weights stored as (in, out) so kernel does x @ W + b)."""
    h1 = size // 4
    h2 = size // 16
    k1, k2, k3, k4, k5, k6 = jax.random.split(key, 6)

    def lin(kw, kb, fan_in, fan_out):
        bound = 1.0 / jnp.sqrt(jnp.float32(fan_in))
        w = jax.random.uniform(kw, (fan_in, fan_out), jnp.float32, -bound, bound)
        b = jax.random.uniform(kb, (1, fan_out), jnp.float32, -bound, bound)
        return w, b

    w1, b1 = lin(k1, k2, size, h1)
    w2, b2 = lin(k3, k4, h1, h2)
    w3, b3 = lin(k5, k6, h2, OUT_CLASSES)
    return (w1, b1, w2, b2, w3, b3)


def prepare_kernel_params(params):
    """Fold fc2 @ fc3 (exact, no nonlinearity between them), pad to lane-dense,
    and cast matmul operands to bf16."""
    w1, b1, w2, b2, w3, b3 = params
    w23 = jnp.dot(w2, w3)          # (h1, 2) f32
    b23 = jnp.dot(b2, w3) + b3     # (1, 2)  f32
    w23 = jnp.pad(w23, ((0, 0), (0, OUT_PAD - OUT_CLASSES)))
    b23 = jnp.pad(b23, ((0, 0), (0, OUT_PAD - OUT_CLASSES)))
    return (w1.astype(jnp.bfloat16), b1, w23.astype(jnp.bfloat16), b23)


if __name__ == "__main__":
    # Small shapes: batch=2, channels=4, spatial=16x16 -> size = 4*16*16 = 1024
    B, C, H, W = 2, 4, 16, 16
    size = C * H * W

    key = jax.random.PRNGKey(0)
    kx, kp = jax.random.split(key)
    x = jax.random.normal(kx, (B, C, H, W), dtype=jnp.float32)
    params = init_params(kp, size)
    kernel_params = prepare_kernel_params(params)

    out = output_forward(x, kernel_params)
    out = jax.block_until_ready(out)

    # Sanity checks: shape and softmax rows sum to 1
    assert out.shape == (B, OUT_CLASSES)
    assert jnp.allclose(jnp.sum(out, axis=1), 1.0, atol=1e-5)
    assert bool(jnp.all(out >= 0.0))

    print("KERNEL_OK")
</pallas_src>

<mosaic_0001>
module attributes {stable_mosaic.version = 11 : i64} {
  func.func @output_kernel(%arg0: i32, %arg1: memref<16x1024xbf16, #tpu.memory_space<vmem>>, %arg2: memref<1024x256xbf16, #tpu.memory_space<vmem>>, %arg3: memref<1x256xf32, #tpu.memory_space<vmem>>, %arg4: memref<256x128xbf16, #tpu.memory_space<vmem>>, %arg5: memref<1x128xf32, #tpu.memory_space<vmem>>, %arg6: memref<16x128xf32, #tpu.memory_space<vmem>>) attributes {dimension_semantics = [#tpu.dimension_semantics<parallel>], iteration_bounds = array<i64: 1>, scalar_prefetch = 0 : i64, scratch_operands = 0 : i64, tpu.core_type = #tpu.core_type<tc>, window_params = [{transform_indices = @transform_0, window_bounds = array<i64: 16, 1024>}, {pipeline_mode = #tpu.pipeline_mode<synchronous>, transform_indices = @transform_1, window_bounds = array<i64: 1024, 256>}, {pipeline_mode = #tpu.pipeline_mode<synchronous>, transform_indices = @transform_2, window_bounds = array<i64: 1, 256>}, {pipeline_mode = #tpu.pipeline_mode<synchronous>, transform_indices = @transform_3, window_bounds = array<i64: 256, 128>}, {pipeline_mode = #tpu.pipeline_mode<synchronous>, transform_indices = @transform_4, window_bounds = array<i64: 1, 128>}, {transform_indices = @transform_5, window_bounds = array<i64: 16, 128>}]} {
    %c0 = arith.constant 0 : index
    %c0_0 = arith.constant 0 : index
    %0 = vector.load %arg1[%c0, %c0_0] : memref<16x1024xbf16, #tpu.memory_space<vmem>>, vector<16x1024xbf16>
    %c0_1 = arith.constant 0 : index
    %c0_2 = arith.constant 0 : index
    %1 = vector.load %arg2[%c0_1, %c0_2] : memref<1024x256xbf16, #tpu.memory_space<vmem>>, vector<1024x256xbf16>
    %cst = arith.constant dense<0.000000e+00> : vector<16x256xf32>
    %2 = tpu.matmul %0, %1, %cst {dimension_numbers = #tpu.dot_dimension_numbers<[1], [0], [0], [1], [0, 0, 1, 1], [], []>} : vector<16x1024xbf16>, vector<1024x256xbf16>, vector<16x256xf32> -> vector<16x256xf32>
    %c0_3 = arith.constant 0 : index
    %c0_4 = arith.constant 0 : index
    %3 = vector.load %arg3[%c0_3, %c0_4] : memref<1x256xf32, #tpu.memory_space<vmem>>, vector<1x256xf32>
    %4 = vector.broadcast %3 : vector<1x256xf32> to vector<16x256xf32>
    %5 = arith.addf %2, %4 : vector<16x256xf32>
    %cst_5 = arith.constant 0.000000e+00 : f32
    %6 = vector.broadcast %cst_5 : f32 to vector<16x256xf32>
    %7 = arith.maximumf %5, %6 : vector<16x256xf32>
    %cst_6 = arith.constant 6.000000e+00 : f32
    %8 = vector.broadcast %cst_6 : f32 to vector<16x256xf32>
    %9 = arith.minimumf %7, %8 : vector<16x256xf32>
    %10 = arith.truncf %9 : vector<16x256xf32> to vector<16x256xbf16>
    %c0_7 = arith.constant 0 : index
    %c0_8 = arith.constant 0 : index
    %11 = vector.load %arg4[%c0_7, %c0_8] : memref<256x128xbf16, #tpu.memory_space<vmem>>, vector<256x128xbf16>
    %cst_9 = arith.constant dense<0.000000e+00> : vector<16x128xf32>
    %12 = tpu.matmul %10, %11, %cst_9 {dimension_numbers = #tpu.dot_dimension_numbers<[1], [0], [0], [1], [0, 0, 1, 1], [], []>} : vector<16x256xbf16>, vector<256x128xbf16>, vector<16x128xf32> -> vector<16x128xf32>
    %c0_10 = arith.constant 0 : index
    %c0_11 = arith.constant 0 : index
    %13 = vector.load %arg5[%c0_10, %c0_11] : memref<1x128xf32, #tpu.memory_space<vmem>>, vector<1x128xf32>
    %14 = vector.broadcast %13 : vector<1x128xf32> to vector<16x128xf32>
    %15 = arith.addf %12, %14 : vector<16x128xf32>
    %16 = tpu.iota {dimensions = array<i32: 1>} : vector<16x128xi32>
    %c2_i32 = arith.constant 2 : i32
    %17 = vector.broadcast %c2_i32 : i32 to vector<16x128xi32>
    %18 = arith.cmpi slt, %16, %17 : vector<16x128xi32>
    %cst_12 = arith.constant 0xFF800000 : f32
    %19 = vector.broadcast %cst_12 : f32 to vector<16x128xf32>
    %20 = arith.select %18, %15, %19 : vector<16x128xi1>, vector<16x128xf32>
    %cst_13 = arith.constant dense<0xFF800000> : vector<16xf32>
    %21 = vector.multi_reduction <maximumf>, %20, %cst_13 [1] : vector<16x128xf32> to vector<16xf32>
    %22 = vector.shape_cast %21 : vector<16xf32> to vector<16x1xf32>
    %23 = vector.broadcast %22 : vector<16x1xf32> to vector<16x128xf32>
    %24 = arith.subf %20, %23 : vector<16x128xf32>
    %25 = math.exp %24 : vector<16x128xf32>
    %cst_14 = arith.constant dense<0.000000e+00> : vector<16xf32>
    %26 = vector.multi_reduction <add>, %25, %cst_14 [1] : vector<16x128xf32> to vector<16xf32>
    %27 = vector.shape_cast %26 : vector<16xf32> to vector<16x1xf32>
    %28 = vector.broadcast %27 : vector<16x1xf32> to vector<16x128xf32>
    %29 = arith.divf %25, %28 : vector<16x128xf32>
    %c0_15 = arith.constant 0 : index
    %c0_16 = arith.constant 0 : index
    %30 = vector.load %arg6[%c0_15, %c0_16] : memref<16x128xf32, #tpu.memory_space<vmem>>, vector<16x128xf32>
    tpu.vector_store %arg6[%c0_15, %c0_16], %29 {strides = array<i32>} : memref<16x128xf32, #tpu.memory_space<vmem>>, vector<16x128xf32>,
    return
  }
  func.func @transform_0(%arg0: i32) -> (i32, i32) {
    %c0_i32 = arith.constant 0 : i32
    %c0_i32_0 = arith.constant 0 : i32
    return %arg0, %c0_i32 : i32, i32
  }
  func.func @transform_1(%arg0: i32) -> (i32, i32) {
    %c0_i32 = arith.constant 0 : i32
    %c0_i32_0 = arith.constant 0 : i32
    %c0_i32_1 = arith.constant 0 : i32
    return %c0_i32, %c0_i32_0 : i32, i32
  }
  func.func @transform_2(%arg0: i32) -> (i32, i32) {
    %c0_i32 = arith.constant 0 : i32
    %c0_i32_0 = arith.constant 0 : i32
    %c0_i32_1 = arith.constant 0 : i32
    return %c0_i32, %c0_i32_0 : i32, i32
  }
  func.func @transform_3(%arg0: i32) -> (i32, i32) {
    %c0_i32 = arith.constant 0 : i32
    %c0_i32_0 = arith.constant 0 : i32
    %c0_i32_1 = arith.constant 0 : i32
    return %c0_i32, %c0_i32_0 : i32, i32
  }
  func.func @transform_4(%arg0: i32) -> (i32, i32) {
    %c0_i32 = arith.constant 0 : i32
    %c0_i32_0 = arith.constant 0 : i32
    %c0_i32_1 = arith.constant 0 : i32
    return %c0_i32, %c0_i32_0 : i32, i32
  }
  func.func @transform_5(%arg0: i32) -> (i32, i32) {
    %c0_i32 = arith.constant 0 : i32
    %c0_i32_0 = arith.constant 0 : i32
    return %arg0, %c0_i32 : i32, i32
  }
}

</mosaic_0001>

<bundles_post_ra>
// kernel: tpu_custom_call.1
= control target key start
LH: loop header
LB: loop body
LE: loop exit
PB: predicated region body
PF: predicated region fallthrough
CT: control target
= control target key end

     0   :  { %10 = vsyncpa [#allocation3], 0  ;;  %s1859_s0 = inlined_call_operand.hbm [shape: bf16[16,1024], index: 0, kind: input, shape index: {}]   ;;  %s1860_s1 = inlined_call_operand.hbm [shape: bf16[1024,256], index: 1, kind: input, shape index: {}]   ;;  %s1861_s2 = inlined_call_operand.vmem [shape: f32[1,256], index: 2, kind: input, shape index: {}]   ;;  %s1862_s3 = inlined_call_operand.hbm [shape: bf16[256,128], index: 3, kind: input, shape index: {}]   ;;  %s1863_s4 = inlined_call_operand.vmem [shape: f32[1,128], index: 4, kind: input, shape index: {}]   ;;  %s1864_s5 = inlined_call_operand.hbm [shape: f32[16,128], index: 5, kind: output, shape index: {}]  }
   0x1   :  { %11 = vsyncpa [#allocation6], 0 }
   0x2   :  { %12 = vsyncpa [#allocation4], 0  ;;  %s1779_s18 = smov [#allocation5]  }
   0x3   :  { %s30_s19 = sshll.u32 %s1779_s18, 4  ;;  %s31_s19 = int_to_ptr.vmem [resolvable:$true] %s30_s19 }
   0x4   :  { %s1701_s20 = scalar_lea.vmem %s31_s19, 16384  ;;  %p1706_p1 = scmp.lt.s32.totalorder %s31_s19, %s31_s19 }
   0x5   :  { %p1702_p0 = scmp.ne.s32.totalorder %s31_s19, %s1701_s20  ;;  %p1707_p2 = scmp.lt.s32.totalorder %s1701_s20, %s1701_s20 }
   0x7   :  { %p1708_p3 = por %p1707_p2, %p1706_p1 }
   0x9   :  { %p1709_p4 = pnand %p1708_p3, %p1702_p0 }
   0xb   :  { %1712 = shalt.err (!%p1709_p4)
}
   0xc   :  { %s1780_s21 = smov 128   ;;  %s1781_s22 = smov 8  }
   0xd   :  { %36 = dma.hbm_to_vmem [thread:$0]  %s1860_s1, 16384, %s31_s19, [#allocation6], %s1780_s21, %s1780_s21, %s1781_s22  }
   0xe   :  { %s1782_s25 = smov [#allocation2]  }
   0xf   :  { %s18_s26 = sshll.u32 %s1782_s25, 4  ;;  %s19_s26 = int_to_ptr.vmem [resolvable:$true] %s18_s26 }
  0x10   :  { %s1721_s27 = scalar_lea.vmem %s19_s26, 1024  ;;  %p1726_p6 = scmp.lt.s32.totalorder %s19_s26, %s19_s26 }
  0x11   :  { %p1722_p5 = scmp.ne.s32.totalorder %s19_s26, %s1721_s27  ;;  %p1727_p7 = scmp.lt.s32.totalorder %s1721_s27, %s1721_s27 }
  0x13   :  { %p1728_p8 = por %p1727_p7, %p1726_p6 }
  0x15   :  { %p1729_p9 = pnand %p1728_p8, %p1722_p5 }
  0x17   :  { %1732 = shalt.err (!%p1729_p9)
}
  0x18   :  { %s1783_s28 = smov 512   ;;  %s1784_s29 = smov 32  }
  0x19   :  { %24 = dma.hbm_to_vmem [thread:$0]  %s1859_s0, 1024, %s19_s26, [#allocation3], %s1783_s28, %s1783_s28, %s1784_s29  }
  0x1a   :  { %s1785_s7 = smov [#allocation7]  }
  0x1b   :  { %s44_s8 = sshll.u32 %s1785_s7, 4  ;;  %s45_s8 = int_to_ptr.vmem [resolvable:$true] %s44_s8 }
  0x1c   :  { %s1741_s1 = scalar_lea.vmem %s45_s8, 2048  ;;  %p1746_p11 = scmp.lt.s32.totalorder %s45_s8, %s45_s8 }
  0x1d   :  { %p1742_p10 = scmp.ne.s32.totalorder %s45_s8, %s1741_s1  ;;  %p1747_p12 = scmp.lt.s32.totalorder %s1741_s1, %s1741_s1 }
  0x1f   :  { %p1748_p13 = por %p1747_p12, %p1746_p11 }
  0x21   :  { %p1749_p0 = pnand %p1748_p13, %p1742_p10 }
  0x23   :  { %1752 = shalt.err (!%p1749_p0)
}
  0x24   :  { %s1786_s9 = smov 64   ;;  %s1787_s10 = smov 4  }
  0x25   :  { %50 = dma.hbm_to_vmem [thread:$0]  %s1862_s3, 2048, %s45_s8, [#allocation6], %s1786_s9, %s1786_s9, %s1787_s10  }
  0x26   :  { %1773 = dma.done.wait [#allocation3], 1024  }
  0x27   :  { %1774 = vsyncadd [#allocation3], 4294966272 }
  0x28   :  { %1775 = dma.done.wait [#allocation6], 18432  }
  0x29   :  { %1776 = vsyncadd [#allocation6], 4294948864  ;;  %v1477_v0 = vld [vmem:[#allocation5 + $0x74] ss:$8 sps:$4 sm:$0xff]   ;;  %v1481_v2 = vld [vmem:[#allocation5 + $0x70] ss:$8 sps:$4 sm:$0xff]  }
  0x2a   :  { %v1479_v1 = vld [vmem:[#allocation5 + $0x174] ss:$8 sps:$4 sm:$0xff]   ;;  %891 = vmatprep.subr.bf16.mxu0 %v1477_v0  ;;  %v1482_v3 = vld [vmem:[#allocation5 + $0x170] ss:$8 sps:$4 sm:$0xff]   ;;  %v1483_v4 = vld [vmem:[#allocation5 + $0x64] ss:$8 sps:$4 sm:$0xff]  }
  0x2b   :  { %934 = vmatprep.subr.bf16.mxu1 %v1479_v1  ;;  %892 = vmatpush1.bf16.msra.mxu0 %v1481_v2  ;;  %v1485_v5 = vld [vmem:[#allocation5 + $0x164] ss:$8 sps:$4 sm:$0xff]   ;;  %v1487_v6 = vld [vmem:[#allocation5 + $0x60] ss:$8 sps:$4 sm:$0xff]   ;;  %v1489_v8 = vld [vmem:[#allocation5 + $0x54] ss:$8 sps:$4 sm:$0xff]  }
  0x2c   :  { %935 = vmatpush1.bf16.msra.mxu1 %v1482_v3  ;;  %893 = vmatprep.subr.bf16.mxu0 %v1483_v4  ;;  %v1488_v7 = vld [vmem:[#allocation5 + $0x160] ss:$8 sps:$4 sm:$0xff]   ;;  %v1491_v9 = vld [vmem:[#allocation5 + $0x154] ss:$8 sps:$4 sm:$0xff]   ;;  %v1493_v10 = vld [vmem:[#allocation5 + $0x50] ss:$8 sps:$4 sm:$0xff]  }
  0x2d   :  { %936 = vmatprep.subr.bf16.mxu1 %v1485_v5  ;;  %v1494_v11 = vld [vmem:[#allocation5 + $0x150] ss:$8 sps:$4 sm:$0xff]   ;;  %v1495_v12 = vld [vmem:[#allocation5 + $0x44] ss:$8 sps:$4 sm:$0xff]   ;;  %v1499_v14 = vld [vmem:[#allocation5 + $0x40] ss:$8 sps:$4 sm:$0xff]  }
  0x2e   :  { %v1497_v13 = vld [vmem:[#allocation5 + $0x144] ss:$8 sps:$4 sm:$0xff]   ;;  %v1500_v15 = vld [vmem:[#allocation5 + $0x140] ss:$8 sps:$4 sm:$0xff]   ;;  %v1501_v16 = vld [vmem:[#allocation5 + $0x34] ss:$8 sps:$4 sm:$0xff]  }
  0x2f   :  { %894 = vmatpush1.bf16.msra.mxu0 %v1487_v6  ;;  %v1503_v17 = vld [vmem:[#allocation5 + $0x134] ss:$8 sps:$4 sm:$0xff]   ;;  %v1505_v18 = vld [vmem:[#allocation5 + $0x30] ss:$8 sps:$4 sm:$0xff]   ;;  %v1507_v20 = vld [vmem:[#allocation5 + $0x24] ss:$8 sps:$4 sm:$0xff]  }
  0x30   :  { %937 = vmatpush1.bf16.msra.mxu1 %v1488_v7  ;;  %895 = vmatprep.subr.bf16.mxu0 %v1489_v8  ;;  %v1506_v19 = vld [vmem:[#allocation5 + $0x130] ss:$8 sps:$4 sm:$0xff]   ;;  %v1509_v21 = vld [vmem:[#allocation5 + $0x124] ss:$8 sps:$4 sm:$0xff]   ;;  %v1511_v22 = vld [vmem:[#allocation5 + $0x20] ss:$8 sps:$4 sm:$0xff]  }
  0x31   :  { %938 = vmatprep.subr.bf16.mxu1 %v1491_v9  ;;  %v1512_v23 = vld [vmem:[#allocation5 + $0x120] ss:$8 sps:$4 sm:$0xff]   ;;  %v1513_v24 = vld [vmem:[#allocation5 + $0x14] ss:$8 sps:$4 sm:$0xff]   ;;  %v1517_v26 = vld [vmem:[#allocation5 + $0x10] ss:$8 sps:$4 sm:$0xff]  }
  0x32   :  { %v1515_v25 = vld [vmem:[#allocation5 + $0x114] ss:$8 sps:$4 sm:$0xff]   ;;  %v1518_v27 = vld [vmem:[#allocation5 + $0x110] ss:$8 sps:$4 sm:$0xff]   ;;  %v1519_v28 = vld [vmem:[#allocation5 + $0x4] ss:$8 sps:$4 sm:$0xff]  }
  0x33   :  { %896 = vmatpush1.bf16.msra.mxu0 %v1493_v10  ;;  %v1521_v29 = vld [vmem:[#allocation5 + $0x104] ss:$8 sps:$4 sm:$0xff]   ;;  %v1523_v30 = vld [vmem:[#allocation5] ss:$8 sps:$4 sm:$0xff]   ;;  %v1525_v32 = vld [vmem:[#allocation5 + $0xf4] ss:$8 sps:$4 sm:$0xff]  }
  0x34   :  { %939 = vmatpush1.bf16.msra.mxu1 %v1494_v11  ;;  %897 = vmatprep.subr.bf16.mxu0 %v1495_v12  ;;  %v1524_v31 = vld [vmem:[#allocation5 + $0x100] ss:$8 sps:$4 sm:$0xff]   ;;  %v1527_v33 = vld [vmem:[#allocation5 + $0x1f4] ss:$8 sps:$4 sm:$0xff]   ;;  %v1529_v34 = vld [vmem:[#allocation5 + $0xf0] ss:$8 sps:$4 sm:$0xff]  }
  0x35   :  { %940 = vmatprep.subr.bf16.mxu1 %v1497_v13  ;;  %v1530_v35 = vld [vmem:[#allocation5 + $0x1f0] ss:$8 sps:$4 sm:$0xff]   ;;  %v1531_v36 = vld [vmem:[#allocation5 + $0xe4] ss:$8 sps:$4 sm:$0xff]   ;;  %v1535_v38 = vld [vmem:[#allocation5 + $0xe0] ss:$8 sps:$4 sm:$0xff]  }
  0x36   :  { %v1533_v37 = vld [vmem:[#allocation5 + $0x1e4] ss:$8 sps:$4 sm:$0xff]   ;;  %v1536_v39 = vld [vmem:[#allocation5 + $0x1e0] ss:$8 sps:$4 sm:$0xff]   ;;  %v1537_v40 = vld [vmem:[#allocation5 + $0xd4] ss:$8 sps:$4 sm:$0xff]  }
  0x37   :  { %898 = vmatpush1.bf16.msra.mxu0 %v1499_v14  ;;  %v1539_v41 = vld [vmem:[#allocation5 + $0x1d4] ss:$8 sps:$4 sm:$0xff]   ;;  %v1541_v42 = vld [vmem:[#allocation5 + $0xd0] ss:$8 sps:$4 sm:$0xff]   ;;  %v1543_v44 = vld [vmem:[#allocation5 + $0xc4] ss:$8 sps:$4 sm:$0xff]  }
  0x38   :  { %941 = vmatpush1.bf16.msra.mxu1 %v1500_v15  ;;  %899 = vmatprep.subr.bf16.mxu0 %v1501_v16  ;;  %v1542_v43 = vld [vmem:[#allocation5 + $0x1d0] ss:$8 sps:$4 sm:$0xff]   ;;  %v1545_v45 = vld [vmem:[#allocation5 + $0x1c4] ss:$8 sps:$4 sm:$0xff]   ;;  %v1547_v46 = vld [vmem:[#allocation5 + $0xc0] ss:$8 sps:$4 sm:$0xff]  }
  0x39   :  { %942 = vmatprep.subr.bf16.mxu1 %v1503_v17  ;;  %v1548_v47 = vld [vmem:[#allocation5 + $0x1c0] ss:$8 sps:$4 sm:$0xff]   ;;  %v1549_v52 = vld [vmem:[#allocation5 + $0xb4] ss:$8 sps:$4 sm:$0xff]   ;;  %v1553_v56 = vld [vmem:[#allocation5 + $0xb0] ss:$8 sps:$4 sm:$0xff]  }
  0x3a   :  { %v63_v48 = vld [vmem:[#allocation2] sm:$0xff]  ;;  %v64_v50 = vld [vmem:[#allocation2 + $0x8] sm:$0xff]  ;;  %v1551_v54 = vld [vmem:[#allocation5 + $0x1b4] ss:$8 sps:$4 sm:$0xff]  }
  0x3b   :  { %900 = vmatpush1.bf16.msra.mxu0 %v1505_v18  ;;  %v67_v49 = vld [vmem:[#allocation2 + $0x20] sm:$0xff]  ;;  %v68_v51 = vld [vmem:[#allocation2 + $0x28] sm:$0xff]  ;;  %v1554_v57 = vld [vmem:[#allocation5 + $0x1b0] ss:$8 sps:$4 sm:$0xff]  }
  0x3c   :  { %943 = vmatpush1.bf16.msra.mxu1 %v1506_v19  ;;  %901 = vmatprep.subr.bf16.mxu0 %v1507_v20  ;;  %v1293_v53 = vcombine.high %v63_v48, %v67_v49  ;;  %v1295_v55 = vcombine.high %v64_v50, %v68_v51  ;;  %v1555_v58 = vld [vmem:[#allocation5 + $0xa4] ss:$8 sps:$4 sm:$0xff]   ;;  %v1559_v60 = vld [vmem:[#allocation5 + $0xa0] ss:$8 sps:$4 sm:$0xff]   ;;  %v1561_v62 = vld [vmem:[#allocation5 + $0x94] ss:$8 sps:$4 sm:$0xff]   ;;  %v1292_v8 = vcombine.low %v63_v48, %v67_v49 }
  0x3d   :  { %944 = vmatprep.subr.bf16.mxu1 %v1509_v21  ;;  %v1557_v59 = vld [vmem:[#allocation5 + $0x1a4] ss:$8 sps:$4 sm:$0xff]   ;;  %v1560_v61 = vld [vmem:[#allocation5 + $0x1a0] ss:$8 sps:$4 sm:$0xff]   ;;  %v1563_v63 = vld [vmem:[#allocation5 + $0x194] ss:$8 sps:$4 sm:$0xff]   ;;  %v1294_v9 = vcombine.low %v64_v50, %v68_v51 }
  0x3e   :  { %923 = vmatprep.mubr.bf16.mxu0 %v1293_v53  ;;  %966 = vmatprep.mubr.bf16.mxu1 %v1295_v55  ;;  %v1565_v0 = vld [vmem:[#allocation5 + $0x90] ss:$8 sps:$4 sm:$0xff]   ;;  %v1567_v2 = vld [vmem:[#allocation5 + $0x84] ss:$8 sps:$4 sm:$0xff]   ;;  %v1571_v4 = vld [vmem:[#allocation5 + $0x80] ss:$8 sps:$4 sm:$0xff]  }
  0x3f   :  { %902 = vmatpush1.bf16.msra.mxu0 %v1511_v22  ;;  %v1566_v1 = vld [vmem:[#allocation5 + $0x190] ss:$8 sps:$4 sm:$0xff]   ;;  %v1569_v3 = vld [vmem:[#allocation5 + $0x184] ss:$8 sps:$4 sm:$0xff]   ;;  %v1572_v5 = vld [vmem:[#allocation5 + $0x180] ss:$8 sps:$4 sm:$0xff]  }
  0x40   :  { %945 = vmatpush1.bf16.msra.mxu1 %v1512_v23  ;;  %903 = vmatprep.subr.bf16.mxu0 %v1513_v24  ;;  %v1575_v6 = vld [vmem:[#allocation5 + $0x274] ss:$8 sps:$4 sm:$0xff]   ;;  %v1573_v10 = vld [vmem:[#allocation5 + $0x270] ss:$8 sps:$4 sm:$0xff]   ;;  %v1581_v12 = vld [vmem:[#allocation5 + $0x264] ss:$8 sps:$4 sm:$0xff]  }
  0x41   :  { %946 = vmatprep.subr.bf16.mxu1 %v1515_v25  ;;  %v1578_v7 = vld [vmem:[#allocation5 + $0x374] ss:$8 sps:$4 sm:$0xff]   ;;  %v1576_v11 = vld [vmem:[#allocation5 + $0x370] ss:$8 sps:$4 sm:$0xff]   ;;  %v1584_v13 = vld [vmem:[#allocation5 + $0x364] ss:$8 sps:$4 sm:$0xff]  }
  0x42   :  { %v1579_v14 = vld [vmem:[#allocation5 + $0x260] ss:$8 sps:$4 sm:$0xff]   ;;  %v1587_v16 = vld [vmem:[#allocation5 + $0x254] ss:$8 sps:$4 sm:$0xff]   ;;  %v1585_v18 = vld [vmem:[#allocation5 + $0x250] ss:$8 sps:$4 sm:$0xff]  }
  0x43   :  { %904 = vmatpush1.bf16.msra.mxu0 %v1517_v26  ;;  %v1582_v15 = vld [vmem:[#allocation5 + $0x360] ss:$8 sps:$4 sm:$0xff]   ;;  %v1590_v17 = vld [vmem:[#allocation5 + $0x354] ss:$8 sps:$4 sm:$0xff]   ;;  %v1588_v19 = vld [vmem:[#allocation5 + $0x350] ss:$8 sps:$4 sm:$0xff]  }
  0x44   :  { %947 = vmatpush1.bf16.msra.mxu1 %v1518_v27  ;;  %905 = vmatprep.subr.bf16.mxu0 %v1519_v28  ;;  %v1593_v20 = vld [vmem:[#allocation5 + $0x244] ss:$8 sps:$4 sm:$0xff]   ;;  %v1591_v22 = vld [vmem:[#allocation5 + $0x240] ss:$8 sps:$4 sm:$0xff]   ;;  %v1599_v24 = vld [vmem:[#allocation5 + $0x234] ss:$8 sps:$4 sm:$0xff]  }
  0x45   :  { %948 = vmatprep.subr.bf16.mxu1 %v1521_v29  ;;  %v1596_v21 = vld [vmem:[#allocation5 + $0x344] ss:$8 sps:$4 sm:$0xff]   ;;  %v1594_v23 = vld [vmem:[#allocation5 + $0x340] ss:$8 sps:$4 sm:$0xff]   ;;  %v1602_v25 = vld [vmem:[#allocation5 + $0x334] ss:$8 sps:$4 sm:$0xff]  }
  0x46   :  { %v1597_v26 = vld [vmem:[#allocation5 + $0x230] ss:$8 sps:$4 sm:$0xff]   ;;  %v1605_v28 = vld [vmem:[#allocation5 + $0x224] ss:$8 sps:$4 sm:$0xff]   ;;  %v1630_v53 = vld [vmem:[#allocation5 + $0x3e0] ss:$8 sps:$4 sm:$0xff]  }
  0x47   :  { %906 = vmatpush1.bf16.msra.mxu0 %v1523_v30  ;;  %v1600_v27 = vld [vmem:[#allocation5 + $0x330] ss:$8 sps:$4 sm:$0xff]   ;;  %v1608_v29 = vld [vmem:[#allocation5 + $0x324] ss:$8 sps:$4 sm:$0xff]   ;;  %v1603_v30 = vld [vmem:[#allocation5 + $0x220] ss:$8 sps:$4 sm:$0xff]  }
  0x48   :  { %949 = vmatpush1.bf16.msra.mxu1 %v1524_v31  ;;  %907 = vmatprep.subr.bf16.mxu0 %v1525_v32  ;;  %v1606_v31 = vld [vmem:[#allocation5 + $0x320] ss:$8 sps:$4 sm:$0xff]   ;;  %v1611_v32 = vld [vmem:[#allocation5 + $0x214] ss:$8 sps:$4 sm:$0xff]   ;;  %v1621_v48 = vld [vmem:[#allocation5 + $0x2f0] ss:$8 sps:$4 sm:$0xff]  }
  0x49   :  { %950 = vmatprep.subr.bf16.mxu1 %v1527_v33  ;;  %v1614_v33 = vld [vmem:[#allocation5 + $0x314] ss:$8 sps:$4 sm:$0xff]   ;;  %v1624_v49 = vld [vmem:[#allocation5 + $0x3f0] ss:$8 sps:$4 sm:$0xff]   ;;  %v1629_v50 = vld [vmem:[#allocation5 + $0x2e4] ss:$8 sps:$4 sm:$0xff]  }
  0x4a   :  { %v1632_v51 = vld [vmem:[#allocation5 + $0x3e4] ss:$8 sps:$4 sm:$0xff]   ;;  %v1638_v55 = vld [vmem:[#allocation5 + $0x3d4] ss:$8 sps:$4 sm:$0xff]  }
  0x4b   :  { %908 = vmatpush2.bf16.msra.mxu0 %v1529_v34  ;;  %v1609_v34 = vld [vmem:[#allocation5 + $0x210] ss:$8 sps:$4 sm:$0xff]  }
  0x4c   :  { %951 = vmatpush2.bf16.msra.mxu1 %v1530_v35  ;;  %909 = vmatprep.subr.bf16.mxu0 %v1531_v36  ;;  %v1612_v35 = vld [vmem:[#allocation5 + $0x310] ss:$8 sps:$4 sm:$0xff]  }
  0x4d   :  { %952 = vmatprep.subr.bf16.mxu1 %v1533_v37  ;;  %v1831_v36 = vld [vmem:[#allocation2 + $0x10] sm:$0xff]  ;;  %v1617_v37 = vld [vmem:[#allocation5 + $0x204] ss:$8 sps:$4 sm:$0xff]  }
  0x4f   :  { %910 = vmatpush2.bf16.msra.mxu0 %v1535_v38  ;;  %v1833_v38 = vld [vmem:[#allocation2 + $0x30] sm:$0xff] }
  0x50   :  { %953 = vmatpush2.bf16.msra.mxu1 %v1536_v39  ;;  %911 = vmatprep.subr.bf16.mxu0 %v1537_v40  ;;  %v1835_v39 = vld [vmem:[#allocation2 + $0x18] sm:$0xff] }
  0x51   :  { %954 = vmatprep.subr.bf16.mxu1 %v1539_v41  ;;  %v1837_v40 = vld [vmem:[#allocation2 + $0x38] sm:$0xff]  ;;  %v1620_v41 = vld [vmem:[#allocation5 + $0x304] ss:$8 sps:$4 sm:$0xff]  }
  0x53   :  { %912 = vmatpush2.bf16.msra.mxu0 %v1541_v42  ;;  %v1297_v42 = vcombine.high %v1831_v36, %v1833_v38 }
  0x54   :  { %955 = vmatpush2.bf16.msra.mxu1 %v1542_v43  ;;  %913 = vmatprep.subr.bf16.mxu0 %v1543_v44  ;;  %v1299_v43 = vcombine.high %v1835_v39, %v1837_v40  ;;  %v1615_v44 = vld [vmem:[#allocation5 + $0x200] ss:$8 sps:$4 sm:$0xff]  }
  0x55   :  { %956 = vmatprep.subr.bf16.mxu1 %v1545_v45  ;;  %v1618_v45 = vld [vmem:[#allocation5 + $0x300] ss:$8 sps:$4 sm:$0xff]  }
  0x57   :  { %914 = vmatpush2.bf16.msra.mxu0 %v1547_v46  ;;  %v1623_v46 = vld [vmem:[#allocation5 + $0x2f4] ss:$8 sps:$4 sm:$0xff]  }
  0x58   :  { %957 = vmatpush2.bf16.msra.mxu1 %v1548_v47  ;;  %915 = vmatprep.subr.bf16.mxu0 %v1549_v52  ;;  %v1626_v47 = vld [vmem:[#allocation5 + $0x3f4] ss:$8 sps:$4 sm:$0xff]   ;;  %v1627_v52 = vld [vmem:[#allocation5 + $0x2e0] ss:$8 sps:$4 sm:$0xff]  }
  0x59   :  { %958 = vmatprep.subr.bf16.mxu1 %v1551_v54  ;;  %v1635_v54 = vld [vmem:[#allocation5 + $0x2d4] ss:$8 sps:$4 sm:$0xff]  }
  0x5b   :  { %916 = vmatpush2.bf16.msra.mxu0 %v1553_v56  ;;  %v1633_v56 = vld [vmem:[#allocation5 + $0x2d0] ss:$8 sps:$4 sm:$0xff]  }
  0x5c   :  { %959 = vmatpush2.bf16.msra.mxu1 %v1554_v57  ;;  %917 = vmatprep.subr.bf16.mxu0 %v1555_v58  ;;  %v1636_v57 = vld [vmem:[#allocation5 + $0x3d0] ss:$8 sps:$4 sm:$0xff]   ;;  %v1641_v58 = vld [vmem:[#allocation5 + $0x2c4] ss:$8 sps:$4 sm:$0xff]  }
  0x5d   :  { %960 = vmatprep.subr.bf16.mxu1 %v1557_v59  ;;  %v1644_v59 = vld [vmem:[#allocation5 + $0x3c4] ss:$8 sps:$4 sm:$0xff]  }
  0x5f   :  { %918 = vmatpush2.bf16.msra.mxu0 %v1559_v60  ;;  %v1639_v60 = vld [vmem:[#allocation5 + $0x2c0] ss:$8 sps:$4 sm:$0xff]  }
  0x60   :  { %961 = vmatpush2.bf16.msra.mxu1 %v1560_v61  ;;  %919 = vmatprep.subr.bf16.mxu0 %v1561_v62  ;;  %v1642_v61 = vld [vmem:[#allocation5 + $0x3c0] ss:$8 sps:$4 sm:$0xff]   ;;  %v1647_v62 = vld [vmem:[#allocation5 + $0x2b4] ss:$8 sps:$4 sm:$0xff]  }
  0x61   :  { %962 = vmatprep.subr.bf16.mxu1 %v1563_v63  ;;  %v1650_v63 = vld [vmem:[#allocation5 + $0x3b4] ss:$8 sps:$4 sm:$0xff]  }
  0x63   :  { %920 = vmatpush2.bf16.msra.mxu0 %v1565_v0  ;;  %v1645_v0 = vld [vmem:[#allocation5 + $0x2b0] ss:$8 sps:$4 sm:$0xff]  }
  0x64   :  { %963 = vmatpush2.bf16.msra.mxu1 %v1566_v1  ;;  %921 = vmatprep.subr.bf16.mxu0 %v1567_v2  ;;  %v1648_v1 = vld [vmem:[#allocation5 + $0x3b0] ss:$8 sps:$4 sm:$0xff]   ;;  %v1653_v2 = vld [vmem:[#allocation5 + $0x2a4] ss:$8 sps:$4 sm:$0xff]  }
  0x65   :  { %964 = vmatprep.subr.bf16.mxu1 %v1569_v3  ;;  %v1656_v3 = vld [vmem:[#allocation5 + $0x3a4] ss:$8 sps:$4 sm:$0xff]  }
  0x67   :  { %922 = vmatpush2.bf16.msra.mxu0 %v1571_v4  ;;  %v1651_v4 = vld [vmem:[#allocation5 + $0x2a0] ss:$8 sps:$4 sm:$0xff]  }
  0x68   :  { %965 = vmatpush2.bf16.msra.mxu1 %v1572_v5  ;;  %977 = vmatprep.subr.bf16.mxu0 %v1575_v6  ;;  %v1654_v5 = vld [vmem:[#allocation5 + $0x3a0] ss:$8 sps:$4 sm:$0xff]   ;;  %v1659_v6 = vld [vmem:[#allocation5 + $0x294] ss:$8 sps:$4 sm:$0xff]  }
  0x69   :  { %1020 = vmatprep.subr.bf16.mxu1 %v1578_v7  ;;  %v1662_v7 = vld [vmem:[#allocation5 + $0x394] ss:$8 sps:$4 sm:$0xff]  }
  0x6a   :  { %924 = vmatmul.mubr.bf16.vlgmr.msra.gmra.mxu0 %v1292_v8  ;;  %v1657_v8 = vld [vmem:[#allocation5 + $0x290] ss:$8 sps:$4 sm:$0xff]  }
  0x6b   :  { %967 = vmatmul.mubr.bf16.vlgmr.msra.gmra.mxu1 %v1294_v9  ;;  %978 = vmatpush1.bf16.msra.mxu0 %v1573_v10  ;;  %v1660_v9 = vld [vmem:[#allocation5 + $0x390] ss:$8 sps:$4 sm:$0xff]   ;;  %v1665_v10 = vld [vmem:[#allocation5 + $0x284] ss:$8 sps:$4 sm:$0xff]  }
  0x6c   :  { %1021 = vmatpush1.bf16.msra.mxu1 %v1576_v11  ;;  %979 = vmatprep.subr.bf16.mxu0 %v1581_v12  ;;  %v1668_v11 = vld [vmem:[#allocation5 + $0x384] ss:$8 sps:$4 sm:$0xff]   ;;  %v1663_v12 = vld [vmem:[#allocation5 + $0x280] ss:$8 sps:$4 sm:$0xff]  }
  0x6d   :  { %1022 = vmatprep.subr.bf16.mxu1 %v1584_v13  ;;  %1009 = vmatprep.mubr.bf16.mxu0 %v1297_v42  ;;  %v1666_v13 = vld [vmem:[#allocation5 + $0x380] ss:$8 sps:$4 sm:$0xff]  }
  0x6e   :  { %1052 = vmatprep.mubr.bf16.mxu1 %v1299_v43 }
  0x6f   :  { %980 = vmatpush1.bf16.msra.mxu0 %v1579_v14  ;;  %v1296_v14 = vcombine.low %v1831_v36, %v1833_v38 }
  0x70   :  { %1023 = vmatpush1.bf16.msra.mxu1 %v1582_v15  ;;  %981 = vmatprep.subr.bf16.mxu0 %v1587_v16  ;;  %v1298_v15 = vcombine.low %v1835_v39, %v1837_v40  ;;  %v1669_v16 = vld [vmem:[#allocation7 + $0x78] sm:$0xff]  }
  0x71   :  { %1024 = vmatprep.subr.bf16.mxu1 %v1590_v17  ;;  %v1670_v17 = vld [vmem:[#allocation7 + $0x38] sm:$0xff]  }
  0x73   :  { %982 = vmatpush1.bf16.msra.mxu0 %v1585_v18  ;;  %v1671_v18 = vld [vmem:[#allocation7 + $0x70] sm:$0xff]  }
  0x74   :  { %1025 = vmatpush1.bf16.msra.mxu1 %v1588_v19  ;;  %983 = vmatprep.subr.bf16.mxu0 %v1593_v20  ;;  %v1672_v19 = vld [vmem:[#allocation7 + $0x30] sm:$0xff]   ;;  %v1673_v20 = vld [vmem:[#allocation7 + $0x68] sm:$0xff]  }
  0x75   :  { %1026 = vmatprep.subr.bf16.mxu1 %v1596_v21  ;;  %v1674_v21 = vld [vmem:[#allocation7 + $0x28] sm:$0xff]  }
  0x77   :  { %984 = vmatpush1.bf16.msra.mxu0 %v1591_v22  ;;  %v1675_v22 = vld [vmem:[#allocation7 + $0x60] sm:$0xff]  }
  0x78   :  { %1027 = vmatpush1.bf16.msra.mxu1 %v1594_v23  ;;  %985 = vmatprep.subr.bf16.mxu0 %v1599_v24  ;;  %v1676_v23 = vld [vmem:[#allocation7 + $0x20] sm:$0xff]   ;;  %v1677_v24 = vld [vmem:[#allocation7 + $0x58] sm:$0xff]  }
  0x79   :  { %1028 = vmatprep.subr.bf16.mxu1 %v1602_v25  ;;  %v1678_v25 = vld [vmem:[#allocation7 + $0x18] sm:$0xff]  }
  0x7b   :  { %986 = vmatpush1.bf16.msra.mxu0 %v1597_v26  ;;  %v1679_v26 = vld [vmem:[#allocation7 + $0x50] sm:$0xff]  }
  0x7c   :  { %1029 = vmatpush1.bf16.msra.mxu1 %v1600_v27  ;;  %987 = vmatprep.subr.bf16.mxu0 %v1605_v28  ;;  %v1680_v27 = vld [vmem:[#allocation7 + $0x10] sm:$0xff]   ;;  %v1681_v28 = vld [vmem:[#allocation7 + $0x48] sm:$0xff]  }
  0x7d   :  { %1030 = vmatprep.subr.bf16.mxu1 %v1608_v29  ;;  %v1682_v29 = vld [vmem:[#allocation7 + $0x8] sm:$0xff]  }
  0x7f   :  { %988 = vmatpush1.bf16.msra.mxu0 %v1603_v30  ;;  %v1683_v30 = vld [vmem:[#allocation7 + $0x40] sm:$0xff]  }
  0x80   :  { %1031 = vmatpush1.bf16.msra.mxu1 %v1606_v31  ;;  %989 = vmatprep.subr.bf16.mxu0 %v1611_v32  ;;  %v1684_v31 = vld [vmem:[#allocation7] sm:$0xff]   ;;  %v201_v32 = vlaneseq }
  0x81   :  { %1032 = vmatprep.subr.bf16.mxu1 %v1614_v33 }
  0x82   :  { %v202_v33 = vshrl.u32 %v201_v32, 7 }
  0x83   :  { %990 = vmatpush1.bf16.msra.mxu0 %v1609_v34 }
  0x84   :  { %1033 = vmatpush1.bf16.msra.mxu1 %v1612_v35  ;;  %991 = vmatprep.subr.bf16.mxu0 %v1617_v37  ;;  %v203_v36 = vsub.s32 0, %v202_v33  ;;  %v199_v37 = vld [vmem:[%s1861_s2] sm:$0x3]  ;;  %v207_v38 = vsub.s32 1, %v202_v33 }
  0x85   :  { %1034 = vmatprep.subr.bf16.mxu1 %v1620_v41 }
  0x86   :  { %v204_v41 = vrot.slane %v199_v37, %v203_v36  ;;  %v208_v42 = vrot.slane %v199_v37, %v207_v38 }
  0x87   :  { %992 = vmatpush1.bf16.msra.mxu0 %v1615_v44 }
  0x88   :  { %1035 = vmatpush1.bf16.msra.mxu1 %v1618_v45  ;;  %993 = vmatprep.subr.bf16.mxu0 %v1623_v46 }
  0x89   :  { %1036 = vmatprep.subr.bf16.mxu1 %v1626_v47 }
  0x8b   :  { %994 = vmatpush2.bf16.msra.mxu0 %v1621_v48 }
  0x8c   :  { %1037 = vmatpush2.bf16.msra.mxu1 %v1624_v49  ;;  %995 = vmatprep.subr.bf16.mxu0 %v1629_v50 }
  0x8d   :  { %1038 = vmatprep.subr.bf16.mxu1 %v1632_v51 }
  0x8f   :  { %996 = vmatpush2.bf16.msra.mxu0 %v1627_v52 }
  0x90   :  { %1039 = vmatpush2.bf16.msra.mxu1 %v1630_v53  ;;  %997 = vmatprep.subr.bf16.mxu0 %v1635_v54 }
  0x91   :  { %1040 = vmatprep.subr.bf16.mxu1 %v1638_v55 }
  0x93   :  { %998 = vmatpush2.bf16.msra.mxu0 %v1633_v56 }
  0x94   :  { %1041 = vmatpush2.bf16.msra.mxu1 %v1636_v57  ;;  %999 = vmatprep.subr.bf16.mxu0 %v1641_v58 }
  0x95   :  { %1042 = vmatprep.subr.bf16.mxu1 %v1644_v59 }
  0x97   :  { %1000 = vmatpush2.bf16.msra.mxu0 %v1639_v60 }
  0x98   :  { %1043 = vmatpush2.bf16.msra.mxu1 %v1642_v61  ;;  %1001 = vmatprep.subr.bf16.mxu0 %v1647_v62 }
  0x99   :  { %1044 = vmatprep.subr.bf16.mxu1 %v1650_v63 }
  0x9b   :  { %1002 = vmatpush2.bf16.msra.mxu0 %v1645_v0 }
  0x9c   :  { %1045 = vmatpush2.bf16.msra.mxu1 %v1648_v1  ;;  %1003 = vmatprep.subr.bf16.mxu0 %v1653_v2 }
  0x9d   :  { %1046 = vmatprep.subr.bf16.mxu1 %v1656_v3 }
  0x9f   :  { %1004 = vmatpush2.bf16.msra.mxu0 %v1651_v4 }
  0xa0   :  { %1047 = vmatpush2.bf16.msra.mxu1 %v1654_v5  ;;  %1005 = vmatprep.subr.bf16.mxu0 %v1659_v6 }
  0xa1   :  { %1048 = vmatprep.subr.bf16.mxu1 %v1662_v7 }
  0xa3   :  { %1006 = vmatpush2.bf16.msra.mxu0 %v1657_v8 }
  0xa4   :  { %1049 = vmatpush2.bf16.msra.mxu1 %v1660_v9  ;;  %1007 = vmatprep.subr.bf16.mxu0 %v1665_v10 }
  0xa5   :  { %1050 = vmatprep.subr.bf16.mxu1 %v1668_v11 }
  0xa7   :  { %1008 = vmatpush2.bf16.msra.mxu0 %v1663_v12 }
  0xa8   :  { %1051 = vmatpush2.bf16.msra.mxu1 %v1666_v13  ;;  %1445 = vmatprep.subr.bf16.mxu0 %v1669_v16 }
  0xaa   :  { %1010 = vmatmul.mubr.bf16.vlgmr.msra.gmra.mxu0 %v1296_v14 }
  0xab   :  { %1053 = vmatmul.mubr.bf16.vlgmr.msra.gmra.mxu1 %v1298_v15  ;;  %1446 = vmatpush3.bf16.msra.mxu0 %v1670_v17 }
  0xac   :  { %1447 = vmatprep.subr.bf16.mxu0 %v1671_v18  ;;  %v1250_v18 = vand.u32 127, %v201_v32 }
  0xae   :  { %vm1251_vm0 = vcmp.lt.s32.totalorder %v1250_v18, 2 }
  0xaf   :  { %1448 = vmatpush3.bf16.msra.mxu0 %v1672_v19 }
  0xb0   :  { %1449 = vmatprep.subr.bf16.mxu0 %v1673_v20  ;;  %v1428_v20 = vld [vmem:[%s1863_s4] ss:$0 sm:$0xff]  ;;  %s1788_s4 = smov [#allocation8]  }
  0xb1   :  { %s1279_s14 = sshll.u32 %s1788_s4, 4  ;;  %s1280_s14 = int_to_ptr.vmem [resolvable:$true] %s1279_s14 }
  0xb2   :  { %s1753_s15 = scalar_lea.vmem %s1280_s14, 256  ;;  %p1758_p2 = scmp.lt.s32.totalorder %s1280_s14, %s1280_s14 }
  0xb3   :  { %1450 = vmatpush3.bf16.msra.mxu0 %v1674_v21  ;;  %p1754_p1 = scmp.ne.s32.totalorder %s1280_s14, %s1753_s15  ;;  %p1759_p3 = scmp.lt.s32.totalorder %s1753_s15, %s1753_s15 }
  0xb4   :  { %1451 = vmatprep.subr.bf16.mxu0 %v1675_v22 }
  0xb5   :  { %p1760_p4 = por %p1759_p3, %p1758_p2 }
  0xb7   :  { %1452 = vmatpush3.bf16.msra.mxu0 %v1676_v23  ;;  %p1761_p5 = pnand %p1760_p4, %p1754_p1 }
  0xb8   :  { %1453 = vmatprep.subr.bf16.mxu0 %v1677_v24 }
  0xbb   :  { %1454 = vmatpush3.bf16.msra.mxu0 %v1678_v25 }
  0xbc   :  { %1455 = vmatprep.subr.bf16.mxu0 %v1679_v26 }
  0xbf   :  { %1456 = vmatpush3.bf16.msra.mxu0 %v1680_v27 }
  0xc0   :  { %1457 = vmatprep.subr.bf16.mxu0 %v1681_v28 }
  0xc3   :  { %1458 = vmatpush3.bf16.msra.mxu0 %v1682_v29 }
  0xc4   :  { %1459 = vmatprep.subr.bf16.mxu0 %v1683_v30 }
  0xc7   :  { %1460 = vmatpush3.bf16.msra.mxu0 %v1684_v31 }
 0x12a   :  { %v925_v34 = vpop.f32.mrf.mxu0 }
 0x12b   :  { %v968_v35 = vpop.f32.mrf.mxu1  ;;  %v926_v45 = vadd.f32 %v925_v34, %v204_v41 }
 0x12c   :  { %v927_v39 = vpop.f32.mrf.mxu0 }
 0x12d   :  { %v970_v40 = vpop.f32.mrf.mxu1  ;;  %v928_v46 = vadd.f32 %v927_v39, %v208_v42  ;;  %v969_v50 = vadd.f32 %v968_v35, %v926_v45 }
 0x12e   :  { %v929_v43 = vpop.f32.mrf.mxu0 }
 0x12f   :  { %v972_v44 = vpop.f32.mrf.mxu1  ;;  %v930_v49 = vadd.f32 %v929_v43, %v204_v41  ;;  %v971_v53 = vadd.f32 %v970_v40, %v928_v46 }
 0x130   :  { %v931_v47 = vpop.f32.mrf.mxu0 }
 0x131   :  { %v974_v48 = vpop.f32.mrf.mxu1  ;;  %v932_v54 = vadd.f32 %v931_v47, %v208_v42  ;;  %v973_v58 = vadd.f32 %v972_v44, %v930_v49 }
 0x133   :  { %v975_v62 = vadd.f32 %v974_v48, %v932_v54 }
 0x16a   :  { %v1011_v51 = vpop.f32.mrf.mxu0 }
 0x16b   :  { %v1054_v52 = vpop.f32.mrf.mxu1  ;;  %v1012_v55 = vadd.f32 %v1011_v51, %v969_v50 }
 0x16c   :  { %v1013_v56 = vpop.f32.mrf.mxu0 }
 0x16d   :  { %v1056_v57 = vpop.f32.mrf.mxu1  ;;  %v1014_v59 = vadd.f32 %v1013_v56, %v971_v53  ;;  %v1055_v1 = vadd.f32 %v1054_v52, %v1012_v55 }
 0x16e   :  { %v1015_v60 = vpop.f32.mrf.mxu0 }
 0x16f   :  { %v1058_v61 = vpop.f32.mrf.mxu1  ;;  %v1057_v63 = vadd.f32 %v1056_v57, %v1014_v59  ;;  %v1016_v0 = vadd.f32 %v1015_v60, %v973_v58  ;;  %v1063_v9 = vmax.f32 %v1055_v1, 0.0 }
 0x170   :  { %v1017_v2 = vpop.f32.mrf.mxu0 }
 0x171   :  { %v1059_v3 = vadd.f32 %v1058_v61, %v1016_v0  ;;  %v1018_v4 = vadd.f32 %v1017_v2, %v975_v62  ;;  %v1060_v5 = vpop.f32.mrf.mxu1  ;;  %v1064_v6 = vmax.f32 %v1057_v63, 0.0  ;;  %v1067_v14 = vmin.f32 %v1063_v9, 6.0 }
 0x173   :  { %v1065_v7 = vmax.f32 %v1059_v3, 0.0  ;;  %v1061_v8 = vadd.f32 %v1060_v5, %v1018_v4  ;;  %v1068_v12 = vmin.f32 %v1064_v6, 6.0 }
 0x175   :  { %v1066_v10 = vmax.f32 %v1061_v8, 0.0  ;;  %v1069_v11 = vmin.f32 %v1065_v7, 6.0 }
 0x177   :  { %v1070_v13 = vmin.f32 %v1066_v10, 6.0  ;;  %v1071_v16 = vpack.c.bf16 %v1069_v11, %v1067_v14 }
 0x179   :  { %v1072_v15 = vpack.c.bf16 %v1070_v13, %v1068_v12 }
 0x17b   :  { %1240 = vmatprep.mubr.bf16.mxu0 %v1072_v15 }
 0x17c   :  { %1241 = vmatmul.mubr.bf16.vlgmr.msra.gmra.mxu0 %v1071_v16 }
 0x23c   :  { %v1461_v17 = vpop.f32.mrf.mxu0 }
 0x23e   :  { %v1462_v19 = vpop.f32.mrf.mxu0 }
 0x23f   :  { %v1463_v21 = vadd.f32 %v1462_v19, %v1461_v17 }
 0x240   :  { %v1464_v22 = vpop.f32.mrf.mxu0 }
 0x241   :  { %v1243_v23 = vadd.f32 %v1463_v21, %v1428_v20 }
 0x242   :  { %v1465_v24 = vpop.f32.mrf.mxu0 }
 0x243   :  { %v1466_v25 = vadd.f32 %v1465_v24, %v1464_v22  ;;  %v1252_v26 = vsel %vm1251_vm0, %v1243_v23, -inf }
 0x244   :  { %1254 = vmax.xlane.f32.xlu0 %v1252_v26 }
 0x245   :  { %v1246_v27 = vadd.f32 %v1466_v25, %v1428_v20 }
 0x247   :  { %v1253_v28 = vsel %vm1251_vm0, %v1246_v27, -inf }
 0x248   :  { %1256 = vmax.xlane.f32.xlu0 %v1253_v28 }
 0x2cd   :  { %v1255_v29 = vpop.xlane.xlu0 %1254 }
 0x2ce   :  { %v1258_v30 = vsub.f32 %v1252_v26, %v1255_v29 }
 0x2d0   :  { %v1260_v31 = vmul.f32 1.442695, %v1258_v30 }
 0x2d1   :  { %v1257_v32 = vpop.xlane.xlu0 %1256 }
 0x2d2   :  { %1685 = vpow2.f32 %v1260_v31  ;;  %v1259_v33 = vsub.f32 %v1253_v28, %v1257_v32 }
 0x2d4   :  { %v1262_v34 = vmul.f32 1.442695, %v1259_v33 }
 0x2d6   :  { %1687 = vpow2.f32 %v1262_v34 }
 0x2df   :  { %v1686_v35 = vpop.eup %1685 }
 0x2e0   :  { %1264 = vadd.xlane.f32.xlu1 %v1686_v35 }
 0x2e3   :  { %v1688_v36 = vpop.eup %1687 }
 0x2e4   :  { %1266 = vadd.xlane.f32.xlu1 %v1688_v36 }
 0x369   :  { %v1265_v37 = vpop.xlane.xlu1 %1264 }
 0x36a   :  { %1689 = vrcp.f32 %v1265_v37 }
 0x36d   :  { %v1267_v38 = vpop.xlane.xlu1 %1266 }
 0x36e   :  { %1691 = vrcp.f32 %v1267_v38 }
 0x377   :  { %v1690_v39 = vpop.eup %1689 }
 0x378   :  { %v1269_v40 = vmul.f32 %v1690_v39, %v1686_v35 }
 0x37a   :  { %1272 = vst [vmem:[#allocation8] sm:$0xff] %v1269_v40 }
 0x37b   :  { %v1692_v41 = vpop.eup %1691 }
 0x37c   :  { %v1271_v42 = vmul.f32 %v1692_v41, %v1688_v36 }
 0x37e   :  { %1273 = vst [vmem:[#allocation8 + $0x8] sm:$0xff] %v1271_v42 }
 0x37f   :  { %1764 = shalt.err (!%p1761_p5)
}
 0x380   :  { %1285 = dma.vmem_to_hbm [thread:$0]  %s1280_s14, 256, %s1864_s5, [#allocation4], %s1780_s21, %s1780_s21, %s1781_s22  }
 0x381   :  { %1777 = dma.done.wait [#allocation4], 256  }
 0x382   :  { %1778 = vsyncadd [#allocation4], 4294967040 }
 0x383   :  { %1289 = vsyncpa [#allocation3], 1 }
 0x384   :  { %1290 = vsyncpa [#allocation6], 1 }
 0x385   :  { %1291 = vsyncpa [#allocation4], 1 }

</bundles_post_ra>
